<compile_context>
chip_gen: v7x
topology: tpu7x:2x2x1
jax: 0.10.0
libtpu: 0.0.40
codegen_flags: <defaults>
</compile_context>

<pallas_src>
import functools

import jax
import jax.numpy as jnp
from jax.experimental import pallas as pl
from jax.experimental.pallas import tpu as pltpu

_LANE = 128


# ----------------------------------------------------------------------------
# Kernels
# ----------------------------------------------------------------------------
def _layernorm_rows_kernel(x_ref, alpha_ref, bias_ref, o_ref, *, eps: float):
    """Generic path: one row per normalization group (F >= 128 / non-foldable)."""
    x = x_ref[...].astype(jnp.float32)                  # (tile_rows, F)
    f = x.shape[-1]
    mean = jnp.mean(x, axis=-1, keepdims=True)          # (R, 1)
    diff = x - mean
    # torch.std default: UNBIASED (ddof=1); eps added OUTSIDE sqrt.
    var = jnp.sum(diff * diff, axis=-1, keepdims=True) * (1.0 / (f - 1))
    inv = pl.reciprocal(jnp.sqrt(var) + eps, approx=False)   # (R, 1)
    alpha = alpha_ref[...].astype(jnp.float32)           # (1, F)
    bias = bias_ref[...].astype(jnp.float32)             # (1, F)
    o_ref[...] = ((diff * inv) * alpha + bias).astype(o_ref.dtype)


def _layernorm_folded_kernel(x_ref, alpha_ref, bias_ref, seg_ref, o_ref,
                             *, eps: float, features: int):
    """Small-F path: g = 128//F rows folded per 128-lane row (lane-dense).

    Per-row statistics become a *segmented* reduce over F-lane segments.  The
    segmented sum AND its broadcast back to every lane of the segment are done
    in a single MXU matmul against a block-diagonal ones matrix (MXU is idle
    in this kernel, so this is essentially free vs the HBM-bound DMA).
    """
    x = x_ref[...].astype(jnp.float32)                   # (R, 128)
    seg = seg_ref[...]                                    # (128, 128) 0/1, f32
    # (x @ seg)[r, j] = sum of x[r, :] over the F-lane segment containing j.
    seg_sum = jnp.dot(x, seg, preferred_element_type=jnp.float32,
                      precision=jax.lax.Precision.HIGHEST)
    mean = seg_sum * (1.0 / features)
    diff = x - mean
    sq_sum = jnp.dot(diff * diff, seg, preferred_element_type=jnp.float32,
                     precision=jax.lax.Precision.HIGHEST)
    var = sq_sum * (1.0 / (features - 1))                 # unbiased (ddof=1)
    inv = pl.reciprocal(jnp.sqrt(var) + eps, approx=False)  # eps OUTSIDE sqrt
    alpha = alpha_ref[...].astype(jnp.float32)            # (1, 128): alpha tiled g times
    bias = bias_ref[...].astype(jnp.float32)
    o_ref[...] = ((diff * inv) * alpha + bias).astype(o_ref.dtype)


# ----------------------------------------------------------------------------
# Tiling / hardware helpers
# ----------------------------------------------------------------------------
def _round_up(a: int, m: int) -> int:
    return ((a + m - 1) // m) * m


def _tpu_hw_params():
    """(vmem_capacity_bytes, num_tensorcores), conservative fallbacks."""
    vmem = 64 * 1024 * 1024          # v7x-sized default: safe on all parts
    cores = 1
    try:
        info = pltpu.get_tpu_info()
        v = getattr(info, "vmem_capacity_bytes", None)
        if isinstance(v, int) and v > 0:
            vmem = v
        for name in ("num_cores", "num_tensorcores", "tensorcores_per_chip",
                     "cores_per_chip"):
            c = getattr(info, name, None)
            if isinstance(c, int) and c > 0:
                cores = c
                break
    except Exception:
        pass
    return vmem, cores


def _pick_tile_rows(n_rows: int, features: int, itemsize: int,
                    vmem_bytes: int, num_cores: int) -> int:
    mult = 8 if itemsize >= 4 else (16 if itemsize == 2 else 32)
    rows_rounded = _round_up(n_rows, mult)

    # ~6 MiB input tiles already reach >=85% of HBM roofline (per-grid-step
    # overhead is ~0.35us); bigger tiles buy <2% and only add VMEM pressure.
    tile = (6 * 1024 * 1024) // max(features * itemsize, 1)
    # Budget the REAL pipelined footprint: 2x double-buffered input + 2x output
    # + ~3 whole-tile f32 temporaries Mosaic keeps live for blocks this size.
    bytes_per_row = features * (4 * itemsize + 3 * 4)
    tile = min(tile, (vmem_bytes * 2 // 5) // max(bytes_per_row, 1))
    tile = max(mult, (tile // mult) * mult)
    tile = min(tile, rows_rounded)

    if num_cores >= 2:
        # Keep both TensorCores busy and balanced: at least 2 grid steps when
        # worthwhile, and an even step count when already tiling.
        steps = -(-n_rows // tile)
        if steps == 1 and rows_rounded >= 2 * mult:
            tile = _round_up((rows_rounded + 1) // 2, mult)
        elif steps > 1 and steps % 2 == 1:
            tile = max(mult, _round_up(-(-n_rows // (steps + 1)), mult))
    return tile


# ----------------------------------------------------------------------------
# Public wrapper
# ----------------------------------------------------------------------------
def layer_normalization(x, alpha, bias, eps: float = 1e-6, tile_rows=None):
    """Pallas TPU LayerNormalization matching the PyTorch module's forward."""
    orig_shape = x.shape
    features = orig_shape[-1]
    x2d = x.reshape(-1, features)
    n_rows = x2d.shape[0]
    itemsize = jnp.dtype(x.dtype).itemsize
    vmem_bytes, num_cores = _tpu_hw_params()
    vmem_limit = min(vmem_bytes * 5 // 8, 96 * 1024 * 1024)

    foldable = (1 < features < _LANE and _LANE % features == 0
                and n_rows % (_LANE // features) == 0)
    # TODO(synk): also fold when n_rows is not a multiple of g (pad the tail
    # rows); those shapes currently take the lane-padded generic path.

    def _run(fold: bool):
        if fold:
            g = _LANE // features
            rows_k, feat_k = n_rows // g, _LANE
            x_k = x2d.reshape(rows_k, feat_k)            # lane-dense layout plumbing
            alpha_k = jnp.tile(alpha.reshape(-1), g).reshape(1, feat_k)
            bias_k = jnp.tile(bias.reshape(-1), g).reshape(1, feat_k)
            seg_id = jnp.arange(feat_k, dtype=jnp.int32) // features
            seg = (seg_id[:, None] == seg_id[None, :]).astype(jnp.float32)
            kernel = functools.partial(_layernorm_folded_kernel,
                                       eps=eps, features=features)
            args = (x_k, alpha_k, bias_k, seg)
        else:
            rows_k, feat_k = n_rows, features
            x_k = x2d
            alpha_k = alpha.reshape(1, feat_k)
            bias_k = bias.reshape(1, feat_k)
            kernel = functools.partial(_layernorm_rows_kernel, eps=eps)
            args = (x_k, alpha_k, bias_k)

        tr = tile_rows
        if tr is None:
            tr = _pick_tile_rows(rows_k, feat_k, itemsize, vmem_bytes, num_cores)

        in_specs = [pl.BlockSpec((tr, feat_k), lambda i: (i, 0)),
                    pl.BlockSpec((1, feat_k), lambda i: (0, 0)),
                    pl.BlockSpec((1, feat_k), lambda i: (0, 0))]
        if fold:
            # Block-diagonal ones matrix stays resident in VMEM (constant index).
            in_specs.append(pl.BlockSpec((feat_k, feat_k), lambda i: (0, 0)))

        n_elems = n_rows * features
        mm_flops = 2 * (2 * rows_k * feat_k * feat_k) if fold else 0
        cost = pl.CostEstimate(
            flops=9 * n_elems + mm_flops,
            transcendentals=2 * n_rows,
            bytes_accessed=2 * n_elems * itemsize
                           + 2 * features * jnp.dtype(alpha.dtype).itemsize,
        )

        out = pl.pallas_call(
            kernel,
            out_shape=jax.ShapeDtypeStruct((rows_k, feat_k), x.dtype),
            grid_spec=pltpu.PrefetchScalarGridSpec(
                num_scalar_prefetch=0,
                grid=(pl.cdiv(rows_k, tr),),   # ragged last block is masked
                in_specs=in_specs,
                out_specs=pl.BlockSpec((tr, feat_k), lambda i: (i, 0)),
            ),
            compiler_params=pltpu.CompilerParams(
                # Row axis is independent work -> multi-TC chips may shard it.
                # TODO(synk): evaluate pltpu.CORE_PARALLEL on v7x if plain
                # "parallel" does not split the row grid across both TCs.
                dimension_semantics=("parallel",),
                vmem_limit_bytes=vmem_limit,
            ),
            cost_estimate=cost,
        )(*args)
        return out.reshape(orig_shape)

    if foldable:
        try:
            return _run(True)
        except Exception:
            # Safety net: if the folded (MXU segmented-reduce) variant fails to
            # lower on a given jax/libtpu build, fall back to the always-correct
            # generic kernel instead of crashing.
            return _run(False)
    return _run(False)


# ----------------------------------------------------------------------------
# Reference + self-test
# ----------------------------------------------------------------------------
def _reference(x, alpha, bias, eps):
    features = x.shape[-1]
    mean = x.mean(axis=-1, keepdims=True)
    std = jnp.sqrt(jnp.sum((x - mean) ** 2, axis=-1, keepdims=True) / (features - 1))
    return alpha * (x - mean) / (std + eps) + bias


if __name__ == "__main__":
    key = jax.random.PRNGKey(0)

    # Shape implied by the module: batch=2, seq=8, hidden=32.
    # F=32 < 128 exercises the lane-folded path (4 rows per 128-lane row).
    batch, seq, features = 2, 8, 32
    x = jax.random.normal(key, (batch, seq, features), dtype=jnp.float32)
    alpha = jnp.ones((features,), dtype=jnp.float32)   # nn.Parameter(torch.ones(F))
    bias = jnp.zeros((features,), dtype=jnp.float32)   # nn.Parameter(torch.zeros(F))
    y = jax.block_until_ready(layer_normalization(x, alpha, bias, eps=1e-6))
    ref = _reference(x, alpha, bias, 1e-6)
    assert jnp.allclose(y, ref, atol=1e-5, rtol=1e-5), "mismatch (folded F=32 case)"

    # Generic lane-dense path (F >= 128) with a ragged row count (111 rows).
    b2, s2, f2 = 3, 37, 256
    x2 = jax.random.normal(jax.random.PRNGKey(1), (b2, s2, f2), dtype=jnp.float32)
    a2 = jax.random.normal(jax.random.PRNGKey(2), (f2,), dtype=jnp.float32)
    bb2 = jax.random.normal(jax.random.PRNGKey(3), (f2,), dtype=jnp.float32)
    y2 = jax.block_until_ready(layer_normalization(x2, a2, bb2, eps=1e-6))
    ref2 = _reference(x2, a2, bb2, 1e-6)
    assert jnp.allclose(y2, ref2, atol=1e-5, rtol=1e-5), "mismatch (generic case)"

    # Folded path with a multi-step pipelined grid and non-trivial alpha/bias.
    b3, s3, f3 = 4, 40, 32
    x3 = jax.random.normal(jax.random.PRNGKey(4), (b3, s3, f3), dtype=jnp.float32)
    a3 = jax.random.normal(jax.random.PRNGKey(5), (f3,), dtype=jnp.float32)
    bb3 = jax.random.normal(jax.random.PRNGKey(6), (f3,), dtype=jnp.float32)
    y3 = jax.block_until_ready(layer_normalization(x3, a3, bb3, eps=1e-6, tile_rows=8))
    ref3 = _reference(x3, a3, bb3, 1e-6)
    assert jnp.allclose(y3, ref3, atol=1e-5, rtol=1e-5), "mismatch (folded multi-step case)"

    print("KERNEL_OK")
</pallas_src>

<mosaic_0001>
module attributes {stable_mosaic.version = 11 : i64} {
  func.func @_layernorm_folded_kernel(%arg0: i32, %arg1: memref<8x128xf32, #tpu.memory_space<vmem>>, %arg2: memref<1x128xf32, #tpu.memory_space<vmem>>, %arg3: memref<1x128xf32, #tpu.memory_space<vmem>>, %arg4: memref<128x128xf32, #tpu.memory_space<vmem>>, %arg5: memref<8x128xf32, #tpu.memory_space<vmem>>) attributes {dimension_semantics = [#tpu.dimension_semantics<parallel>], iteration_bounds = array<i64: 1>, scalar_prefetch = 0 : i64, scratch_operands = 0 : i64, tpu.core_type = #tpu.core_type<tc>, window_params = [{transform_indices = @transform_0, window_bounds = array<i64: 8, 128>}, {pipeline_mode = #tpu.pipeline_mode<synchronous>, transform_indices = @transform_1, window_bounds = array<i64: 1, 128>}, {pipeline_mode = #tpu.pipeline_mode<synchronous>, transform_indices = @transform_2, window_bounds = array<i64: 1, 128>}, {pipeline_mode = #tpu.pipeline_mode<synchronous>, transform_indices = @transform_3, window_bounds = array<i64: 128, 128>}, {transform_indices = @transform_4, window_bounds = array<i64: 8, 128>}]} {
    %c0 = arith.constant 0 : index
    %c0_0 = arith.constant 0 : index
    %0 = vector.load %arg1[%c0, %c0_0] : memref<8x128xf32, #tpu.memory_space<vmem>>, vector<8x128xf32>
    %c0_1 = arith.constant 0 : index
    %c0_2 = arith.constant 0 : index
    %1 = vector.load %arg4[%c0_1, %c0_2] : memref<128x128xf32, #tpu.memory_space<vmem>>, vector<128x128xf32>
    %cst = arith.constant dense<0.000000e+00> : vector<8x128xf32>
    %2 = tpu.matmul %0, %1, %cst {dimension_numbers = #tpu.dot_dimension_numbers<[1], [0], [0], [1], [0, 0, 1, 1], [], []>, precision = #tpu.contract_precision<fp32>} : vector<8x128xf32>, vector<128x128xf32>, vector<8x128xf32> -> vector<8x128xf32>
    %cst_3 = arith.constant 3.125000e-02 : f32
    %3 = vector.broadcast %cst_3 : f32 to vector<8x128xf32>
    %4 = arith.mulf %2, %3 : vector<8x128xf32>
    %5 = arith.subf %0, %4 : vector<8x128xf32>
    %6 = arith.mulf %5, %5 : vector<8x128xf32>
    %cst_4 = arith.constant dense<0.000000e+00> : vector<8x128xf32>
    %7 = tpu.matmul %6, %1, %cst_4 {dimension_numbers = #tpu.dot_dimension_numbers<[1], [0], [0], [1], [0, 0, 1, 1], [], []>, precision = #tpu.contract_precision<fp32>} : vector<8x128xf32>, vector<128x128xf32>, vector<8x128xf32> -> vector<8x128xf32>
    %cst_5 = arith.constant 0.0322580636 : f32
    %8 = vector.broadcast %cst_5 : f32 to vector<8x128xf32>
    %9 = arith.mulf %7, %8 : vector<8x128xf32>
    %10 = math.sqrt %9 : vector<8x128xf32>
    %cst_6 = arith.constant 9.99999997E-7 : f32
    %11 = vector.broadcast %cst_6 : f32 to vector<8x128xf32>
    %12 = arith.addf %10, %11 : vector<8x128xf32>
    %13 = tpu.reciprocal %12 : vector<8x128xf32> -> vector<8x128xf32>
    %c0_7 = arith.constant 0 : index
    %c0_8 = arith.constant 0 : index
    %14 = vector.load %arg2[%c0_7, %c0_8] : memref<1x128xf32, #tpu.memory_space<vmem>>, vector<1x128xf32>
    %c0_9 = arith.constant 0 : index
    %c0_10 = arith.constant 0 : index
    %15 = vector.load %arg3[%c0_9, %c0_10] : memref<1x128xf32, #tpu.memory_space<vmem>>, vector<1x128xf32>
    %16 = arith.mulf %5, %13 : vector<8x128xf32>
    %17 = vector.broadcast %14 : vector<1x128xf32> to vector<8x128xf32>
    %18 = arith.mulf %16, %17 : vector<8x128xf32>
    %19 = vector.broadcast %15 : vector<1x128xf32> to vector<8x128xf32>
    %20 = arith.addf %18, %19 : vector<8x128xf32>
    %c0_11 = arith.constant 0 : index
    %c0_12 = arith.constant 0 : index
    %21 = vector.load %arg5[%c0_11, %c0_12] : memref<8x128xf32, #tpu.memory_space<vmem>>, vector<8x128xf32>
    tpu.vector_store %arg5[%c0_11, %c0_12], %20 {strides = array<i32>} : memref<8x128xf32, #tpu.memory_space<vmem>>, vector<8x128xf32>,
    return
  }
  func.func @transform_0(%arg0: i32) -> (i32, i32) {
    %c0_i32 = arith.constant 0 : i32
    %c0_i32_0 = arith.constant 0 : i32
    return %arg0, %c0_i32 : i32, i32
  }
  func.func @transform_1(%arg0: i32) -> (i32, i32) {
    %c0_i32 = arith.constant 0 : i32
    %c0_i32_0 = arith.constant 0 : i32
    %c0_i32_1 = arith.constant 0 : i32
    return %c0_i32, %c0_i32_0 : i32, i32
  }
  func.func @transform_2(%arg0: i32) -> (i32, i32) {
    %c0_i32 = arith.constant 0 : i32
    %c0_i32_0 = arith.constant 0 : i32
    %c0_i32_1 = arith.constant 0 : i32
    return %c0_i32, %c0_i32_0 : i32, i32
  }
  func.func @transform_3(%arg0: i32) -> (i32, i32) {
    %c0_i32 = arith.constant 0 : i32
    %c0_i32_0 = arith.constant 0 : i32
    %c0_i32_1 = arith.constant 0 : i32
    return %c0_i32, %c0_i32_0 : i32, i32
  }
  func.func @transform_4(%arg0: i32) -> (i32, i32) {
    %c0_i32 = arith.constant 0 : i32
    %c0_i32_0 = arith.constant 0 : i32
    return %arg0, %c0_i32 : i32, i32
  }
}

module attributes {stable_mosaic.version = 11 : i64} {
  func.func @_layernorm_rows_kernel(%arg0: i32, %arg1: memref<16x32xf32, #tpu.memory_space<vmem>>, %arg2: memref<1x32xf32, #tpu.memory_space<vmem>>, %arg3: memref<1x32xf32, #tpu.memory_space<vmem>>, %arg4: memref<16x32xf32, #tpu.memory_space<vmem>>) attributes {dimension_semantics = [#tpu.dimension_semantics<parallel>], iteration_bounds = array<i64: 1>, scalar_prefetch = 0 : i64, scratch_operands = 0 : i64, tpu.core_type = #tpu.core_type<tc>, window_params = [{transform_indices = @transform_0, window_bounds = array<i64: 16, 32>}, {pipeline_mode = #tpu.pipeline_mode<synchronous>, transform_indices = @transform_1, window_bounds = array<i64: 1, 32>}, {pipeline_mode = #tpu.pipeline_mode<synchronous>, transform_indices = @transform_2, window_bounds = array<i64: 1, 32>}, {transform_indices = @transform_3, window_bounds = array<i64: 16, 32>}]} {
    %c0 = arith.constant 0 : index
    %c0_0 = arith.constant 0 : index
    %0 = vector.load %arg1[%c0, %c0_0] : memref<16x32xf32, #tpu.memory_space<vmem>>, vector<16x32xf32>
    %cst = arith.constant dense<0.000000e+00> : vector<16xf32>
    %1 = vector.multi_reduction <add>, %0, %cst [1] : vector<16x32xf32> to vector<16xf32>
    %2 = vector.shape_cast %1 : vector<16xf32> to vector<16x1xf32>
    %cst_1 = arith.constant 3.200000e+01 : f32
    %3 = vector.broadcast %cst_1 : f32 to vector<16x1xf32>
    %4 = arith.divf %2, %3 : vector<16x1xf32>
    %5 = vector.broadcast %4 : vector<16x1xf32> to vector<16x32xf32>
    %6 = arith.subf %0, %5 : vector<16x32xf32>
    %7 = arith.mulf %6, %6 : vector<16x32xf32>
    %cst_2 = arith.constant dense<0.000000e+00> : vector<16xf32>
    %8 = vector.multi_reduction <add>, %7, %cst_2 [1] : vector<16x32xf32> to vector<16xf32>
    %9 = vector.shape_cast %8 : vector<16xf32> to vector<16x1xf32>
    %cst_3 = arith.constant 0.0322580636 : f32
    %10 = vector.broadcast %cst_3 : f32 to vector<16x1xf32>
    %11 = arith.mulf %9, %10 : vector<16x1xf32>
    %12 = math.sqrt %11 : vector<16x1xf32>
    %cst_4 = arith.constant 9.99999997E-7 : f32
    %13 = vector.broadcast %cst_4 : f32 to vector<16x1xf32>
    %14 = arith.addf %12, %13 : vector<16x1xf32>
    %15 = tpu.reciprocal %14 : vector<16x1xf32> -> vector<16x1xf32>
    %c0_5 = arith.constant 0 : index
    %c0_6 = arith.constant 0 : index
    %16 = vector.load %arg2[%c0_5, %c0_6] : memref<1x32xf32, #tpu.memory_space<vmem>>, vector<1x32xf32>
    %c0_7 = arith.constant 0 : index
    %c0_8 = arith.constant 0 : index
    %17 = vector.load %arg3[%c0_7, %c0_8] : memref<1x32xf32, #tpu.memory_space<vmem>>, vector<1x32xf32>
    %18 = vector.broadcast %15 : vector<16x1xf32> to vector<16x32xf32>
    %19 = arith.mulf %6, %18 : vector<16x32xf32>
    %20 = vector.broadcast %16 : vector<1x32xf32> to vector<16x32xf32>
    %21 = arith.mulf %19, %20 : vector<16x32xf32>
    %22 = vector.broadcast %17 : vector<1x32xf32> to vector<16x32xf32>
    %23 = arith.addf %21, %22 : vector<16x32xf32>
    %c0_9 = arith.constant 0 : index
    %c0_10 = arith.constant 0 : index
    %24 = vector.load %arg4[%c0_9, %c0_10] : memref<16x32xf32, #tpu.memory_space<vmem>>, vector<16x32xf32>
    tpu.vector_store %arg4[%c0_9, %c0_10], %23 {strides = array<i32>} : memref<16x32xf32, #tpu.memory_space<vmem>>, vector<16x32xf32>,
    return
  }
  func.func @transform_0(%arg0: i32) -> (i32, i32) {
    %c0_i32 = arith.constant 0 : i32
    %c0_i32_0 = arith.constant 0 : i32
    return %arg0, %c0_i32 : i32, i32
  }
  func.func @transform_1(%arg0: i32) -> (i32, i32) {
    %c0_i32 = arith.constant 0 : i32
    %c0_i32_0 = arith.constant 0 : i32
    %c0_i32_1 = arith.constant 0 : i32
    return %c0_i32, %c0_i32_0 : i32, i32
  }
  func.func @transform_2(%arg0: i32) -> (i32, i32) {
    %c0_i32 = arith.constant 0 : i32
    %c0_i32_0 = arith.constant 0 : i32
    %c0_i32_1 = arith.constant 0 : i32
    return %c0_i32, %c0_i32_0 : i32, i32
  }
  func.func @transform_3(%arg0: i32) -> (i32, i32) {
    %c0_i32 = arith.constant 0 : i32
    %c0_i32_0 = arith.constant 0 : i32
    return %arg0, %c0_i32 : i32, i32
  }
}

</mosaic_0001>

<bundles_post_ra>
// kernel: tpu_custom_call.1
= control target key start
LH: loop header
LB: loop body
LE: loop exit
PB: predicated region body
PF: predicated region fallthrough
CT: control target
= control target key end

     0   :  { %9 = vsyncpa [#allocation3], 0  ;;  %s2888_s0 = inlined_call_operand.hbm [shape: f32[4,128], index: 0, kind: input, shape index: {}]   ;;  %s2889_s1 = inlined_call_operand.vmem [shape: f32[1,128], index: 1, kind: input, shape index: {}]   ;;  %s2890_s2 = inlined_call_operand.vmem [shape: f32[1,128], index: 2, kind: input, shape index: {}]   ;;  %s2891_s3 = inlined_call_operand.hbm [shape: f32[128,128], index: 3, kind: input, shape index: {}]   ;;  %s2892_s4 = inlined_call_operand.hbm [shape: f32[4,128], index: 4, kind: output, shape index: {}]  }
   0x1   :  { %10 = vsyncpa [#allocation6], 0 }
   0x2   :  { %11 = vsyncpa [#allocation4], 0 }
   0x3   :  { %16 = vsyncadd [#allocation3], 64  ;;  %s2414_s15 = smov [#allocation2]   ;;  %s2342_s19 = scalar_lea.hbm %s2888_s0, 64 }
   0x4   :  { %s17_s16 = sshll.u32 %s2414_s15, 4  ;;  %p2343_p0 = scmp.ne.s32.totalorder %s2888_s0, %s2342_s19  ;;  %s18_s16 = int_to_ptr.vmem [resolvable:$true] %s17_s16 }
   0x5   :  { %p2346_p1 = scmp.lt.u32.totalorder %s2342_s19, %s2888_s0 }
   0x7   :  { %p2348_p2 = pnand %p2346_p1, %p2343_p0 }
   0x9   :  { %2351 = shalt.err (!%p2348_p2)
}
   0xa   :  { %s2352_s24 = scalar_lea.vmem %s18_s16, 64  ;;  %s2356_s25 = scalar_lea.vmem %s18_s16, 128 }
   0xb   :  { %p2353_p3 = scmp.ne.s32.totalorder %s18_s16, %s2352_s24  ;;  %p2357_p4 = scmp.lt.s32.totalorder %s18_s16, %s18_s16 }
   0xc   :  { %p2358_p5 = scmp.lt.s32.totalorder %s2356_s25, %s2352_s24 }
   0xe   :  { %p2359_p6 = por %p2358_p5, %p2357_p4 }
  0x10   :  { %p2360_p7 = pnand %p2359_p6, %p2353_p3 }
  0x12   :  { %2363 = shalt.err (!%p2360_p7)
}
  0x13   :  { %s2415_s26 = smov 64   ;;  %s2416_s27 = smov 4  }
  0x14   :  { %23 = dma.hbm_to_vmem [thread:$0]  %s2888_s0, 64, %s18_s16, [#allocation3], %s2415_s26, %s2415_s26, %s2416_s27  }
  0x15   :  { %s2417_s30 = smov [#allocation5]   ;;  %s2364_s8 = scalar_lea.hbm %s2891_s3, 2048 }
  0x16   :  { %s33_s5 = sshll.u32 %s2417_s30, 4  ;;  %p2365_p8 = scmp.ne.s32.totalorder %s2891_s3, %s2364_s8  ;;  %s34_s5 = int_to_ptr.vmem [resolvable:$true] %s33_s5 }
  0x17   :  { %p2368_p9 = scmp.lt.u32.totalorder %s2364_s8, %s2891_s3 }
  0x19   :  { %p2370_p10 = pnand %p2368_p9, %p2365_p8 }
  0x1b   :  { %2373 = shalt.err (!%p2370_p10)
}
  0x1c   :  { %s2374_s13 = scalar_lea.vmem %s34_s5, 2048  ;;  %p2379_p12 = scmp.lt.s32.totalorder %s34_s5, %s34_s5 }
  0x1d   :  { %p2375_p11 = scmp.ne.s32.totalorder %s34_s5, %s2374_s13  ;;  %p2380_p13 = scmp.lt.s32.totalorder %s2374_s13, %s2374_s13 }
  0x1f   :  { %p2381_p0 = por %p2380_p13, %p2379_p12 }
  0x21   :  { %p2382_p1 = pnand %p2381_p0, %p2375_p11 }
  0x23   :  { %2385 = shalt.err (!%p2382_p1)
}
  0x24   :  { %s2418_s0 = smov 128   ;;  %s2419_s14 = smov 8  }
  0x25   :  { %39 = dma.hbm_to_vmem [thread:$0]  %s2891_s3, 2048, %s34_s5, [#allocation6], %s2418_s0, %s2418_s0, %s2419_s14  }
  0x26   :  { %2408 = dma.done.wait [#allocation3], 128  }
  0x27   :  { %2409 = vsyncadd [#allocation3], 4294967168 }
  0x28   :  { %2410 = dma.done.wait [#allocation6], 2048  }
  0x29   :  { %2411 = vsyncadd [#allocation6], 4294965248  ;;  %v2420_v0 = vmov 0.0|0.0   ;;  %vm2421_vm0 = vmmov 0   ;;  %v2422_v1 = vmov 0.0   ;;  %v47_v2 = vld [vmem:[#allocation5] sm:$0xff] }
  0x2a   :  { %2020 = vmatprep.subr.bf16.mxu0 %v2420_v0  ;;  %1632 = vmatprep.mubr.msk.f32.mxu0 %vm2421_vm0, %v2422_v1  ;;  %v48_v3 = vld [vmem:[#allocation5 + $0x8] sm:$0xff]  ;;  %v49_v4 = vld [vmem:[#allocation5 + $0x10] sm:$0xff]  ;;  %v64_v5 = vand.u32 4294901760, %v47_v2  ;;  %v50_v7 = vld [vmem:[#allocation5 + $0x18] sm:$0xff] }
  0x2b   :  { %2164 = vmatprep.subr.bf16.mxu1 %v2420_v0  ;;  %1842 = vmatprep.mubr.msk.f32.mxu1 %vm2421_vm0, %v2422_v1  ;;  %v67_v6 = vand.u32 4294901760, %v48_v3  ;;  %v70_v8 = vand.u32 4294901760, %v49_v4  ;;  %v73_v9 = vand.u32 4294901760, %v50_v7  ;;  %v51_v10 = vld [vmem:[#allocation5 + $0x20] sm:$0xff]  ;;  %v52_v11 = vld [vmem:[#allocation5 + $0x28] sm:$0xff]  ;;  %v53_v16 = vld [vmem:[#allocation5 + $0x30] sm:$0xff] }
  0x2c   :  { %v76_v14 = vand.u32 4294901760, %v51_v10  ;;  %v79_v15 = vand.u32 4294901760, %v52_v11  ;;  %v54_v17 = vld [vmem:[#allocation5 + $0x38] sm:$0xff]  ;;  %v82_v19 = vand.u32 4294901760, %v53_v16  ;;  %v55_v21 = vld [vmem:[#allocation5 + $0x40] sm:$0xff]  ;;  %v56_v23 = vld [vmem:[#allocation5 + $0x48] sm:$0xff]  ;;  %v2504_v34 = vsub.f32 %v47_v2, %v64_v5 }
  0x2d   :  { %v2482_v12 = vpack.c.bf16 %v67_v6, %v64_v5  ;;  %v2485_v13 = vpack.c.bf16 %v73_v9, %v70_v8  ;;  %v85_v20 = vand.u32 4294901760, %v54_v17  ;;  %v2493_v22 = vld [vmem:[#allocation2] sm:$0xff]  ;;  %v57_v24 = vld [vmem:[#allocation5 + $0x50] sm:$0xff]  ;;  %v59_v26 = vld [vmem:[#allocation5 + $0x60] sm:$0xff]  ;;  %v88_v27 = vand.u32 4294901760, %v55_v21 }
  0x2e   :  { %v2491_v18 = vpack.c.bf16 %v79_v15, %v76_v14  ;;  %v58_v25 = vld [vmem:[#allocation5 + $0x58] sm:$0xff]  ;;  %v60_v28 = vld [vmem:[#allocation5 + $0x68] sm:$0xff]  ;;  %v61_v29 = vld [vmem:[#allocation5 + $0x70] sm:$0xff]  ;;  %v2499_v31 = vand.u32 4294901760, %v2493_v22  ;;  %v91_v33 = vand.u32 4294901760, %v56_v23  ;;  %v2506_v35 = vsub.f32 %v48_v3, %v67_v6 }
  0x2f   :  { %2022 = vmatpush3.bf16.msra.mxu0 %v2482_v12  ;;  %2166 = vmatpush3.bf16.msra.mxu1 %v2482_v12  ;;  %v62_v30 = vld [vmem:[#allocation5 + $0x78] sm:$0xff]  ;;  %v2502_v32 = vpack.c.bf16 %v85_v20, %v82_v19  ;;  %v94_v36 = vand.u32 4294901760, %v57_v24  ;;  %v97_v37 = vand.u32 4294901760, %v58_v25  ;;  %v100_v38 = vand.u32 4294901760, %v59_v26 }
  0x30   :  { %2023 = vmatprep.subr.bf16.mxu0 %v2420_v0  ;;  %2167 = vmatprep.subr.bf16.mxu1 %v2420_v0  ;;  %v103_v39 = vand.u32 4294901760, %v60_v28  ;;  %v106_v40 = vand.u32 4294901760, %v61_v29  ;;  %v109_v41 = vand.u32 4294901760, %v62_v30  ;;  %v2513_v42 = vsub.f32 %v2493_v22, %v2499_v31 }
  0x31   :  { %v2515_v43 = vsub.f32 %v49_v4, %v70_v8  ;;  %v2518_v44 = vpack.c.bf16 %v91_v33, %v88_v27  ;;  %v157_v45 = vand.u32 4294901760, %v2504_v34  ;;  %v164_v46 = vand.u32 4294901760, %v2506_v35 }
  0x32   :  { %v2522_v47 = vsub.f32 %v50_v7, %v73_v9  ;;  %v2526_v48 = vsub.f32 %v51_v10, %v76_v14  ;;  %v2529_v49 = vpack.c.bf16 %v97_v37, %v94_v36  ;;  %v2531_v50 = vpack.c.bf16 %v103_v39, %v100_v38 }
  0x33   :  { %2025 = vmatpush3.bf16.msra.mxu0 %v2485_v13  ;;  %2169 = vmatpush3.bf16.msra.mxu1 %v2485_v13  ;;  %v2533_v51 = vpack.c.bf16 %v109_v41, %v106_v40  ;;  %v146_v52 = vand.u32 4294901760, %v2513_v42  ;;  %v171_v53 = vand.u32 4294901760, %v2515_v43  ;;  %v2537_v54 = vsub.f32 %v52_v11, %v79_v15 }
  0x34   :  { %2026 = vmatprep.subr.bf16.mxu0 %v2420_v0  ;;  %2170 = vmatprep.subr.bf16.mxu1 %v2420_v0  ;;  %v2539_v55 = vsub.f32 %v53_v16, %v82_v19  ;;  %v158_v56 = vsub.f32 %v2504_v34, %v157_v45  ;;  %v165_v57 = vsub.f32 %v2506_v35, %v164_v46  ;;  %v178_v58 = vand.u32 4294901760, %v2522_v47 }
  0x35   :  { %v2545_v59 = vsub.f32 %v54_v17, %v85_v20  ;;  %v185_v60 = vand.u32 4294901760, %v2526_v48  ;;  %v2550_v61 = vsub.f32 %v55_v21, %v88_v27  ;;  %v2552_v62 = vsub.f32 %v56_v23, %v91_v33 }
  0x36   :  { %v2554_v63 = vsub.f32 %v57_v24, %v94_v36  ;;  %v2557_v2 = vsub.f32 %v58_v25, %v97_v37  ;;  %v2559_v3 = vsub.f32 %v59_v26, %v100_v38  ;;  %v2561_v4 = vsub.f32 %v60_v28, %v103_v39 }
  0x37   :  { %2028 = vmatpush3.bf16.msra.mxu0 %v2491_v18  ;;  %2172 = vmatpush3.bf16.msra.mxu1 %v2491_v18  ;;  %v2563_v5 = vsub.f32 %v61_v29, %v106_v40  ;;  %v147_v6 = vsub.f32 %v2513_v42, %v146_v52  ;;  %v172_v7 = vsub.f32 %v2515_v43, %v171_v53  ;;  %v192_v8 = vand.u32 4294901760, %v2537_v54 }
  0x38   :  { %2029 = vmatprep.subr.bf16.mxu0 %v2420_v0  ;;  %2173 = vmatprep.subr.bf16.mxu1 %v2420_v0  ;;  %v2570_v9 = vsub.f32 %v62_v30, %v109_v41  ;;  %v159_v10 = vand.u32 4294901760, %v158_v56  ;;  %v166_v11 = vand.u32 4294901760, %v165_v57  ;;  %v179_v14 = vsub.f32 %v2522_v47, %v178_v58 }
  0x39   :  { %v199_v15 = vand.u32 4294901760, %v2539_v55  ;;  %v206_v16 = vand.u32 4294901760, %v2545_v59  ;;  %v213_v17 = vand.u32 4294901760, %v2550_v61  ;;  %v220_v19 = vand.u32 4294901760, %v2552_v62 }
  0x3a   :  { %v227_v20 = vand.u32 4294901760, %v2554_v63  ;;  %v234_v21 = vand.u32 4294901760, %v2557_v2  ;;  %v241_v23 = vand.u32 4294901760, %v2559_v3  ;;  %v248_v24 = vand.u32 4294901760, %v2561_v4 }
  0x3b   :  { %2031 = vmatpush3.bf16.msra.mxu0 %v2502_v32  ;;  %2175 = vmatpush3.bf16.msra.mxu1 %v2502_v32  ;;  %v255_v25 = vand.u32 4294901760, %v2563_v5  ;;  %v262_v26 = vand.u32 4294901760, %v2570_v9  ;;  %v2587_v27 = vpack.c.bf16 %v164_v46, %v157_v45  ;;  %v2589_v28 = vpack.c.bf16 %v178_v58, %v171_v53 }
  0x3c   :  { %2032 = vmatprep.subr.bf16.mxu0 %v2420_v0  ;;  %2176 = vmatprep.subr.bf16.mxu1 %v2420_v0  ;;  %v2591_v29 = vpack.c.bf16 %v192_v8, %v185_v60  ;;  %v2594_v30 = vpack.c.bf16 %v206_v16, %v199_v15  ;;  %v2596_v33 = vpack.c.bf16 %v220_v19, %v213_v17  ;;  %v148_v39 = vand.u32 4294901760, %v147_v6 }
  0x3d   :  { %v2598_v36 = vpack.c.bf16 %v234_v21, %v227_v20  ;;  %v2600_v37 = vpack.c.bf16 %v248_v24, %v241_v23  ;;  %v2603_v38 = vpack.c.bf16 %v262_v26, %v255_v25  ;;  %v186_v40 = vsub.f32 %v2526_v48, %v185_v60 }
  0x3e   :  { %v2609_v41 = vpack.c.bf16 %v166_v11, %v159_v10  ;;  %v173_v45 = vand.u32 4294901760, %v172_v7  ;;  %v180_v46 = vand.u32 4294901760, %v179_v14  ;;  %v193_v53 = vsub.f32 %v2537_v54, %v192_v8 }
  0x3f   :  { %2034 = vmatpush3.bf16.msra.mxu0 %v2518_v44  ;;  %2178 = vmatpush3.bf16.msra.mxu1 %v2518_v44  ;;  %v200_v56 = vsub.f32 %v2539_v55, %v199_v15  ;;  %v187_v58 = vand.u32 4294901760, %v186_v40  ;;  %v207_v6 = vsub.f32 %v2545_v59, %v206_v16  ;;  %v214_v11 = vsub.f32 %v2550_v61, %v213_v17 }
  0x40   :  { %2035 = vmatprep.subr.bf16.mxu0 %v2420_v0  ;;  %2179 = vmatprep.subr.bf16.mxu1 %v2420_v0  ;;  %v2617_v57 = vpack.c.bf16 %v180_v46, %v173_v45  ;;  %v194_v60 = vand.u32 4294901760, %v193_v53  ;;  %v221_v14 = vsub.f32 %v2552_v62, %v220_v19  ;;  %v228_v15 = vsub.f32 %v2554_v63, %v227_v20 }
  0x41   :  { %v201_v7 = vand.u32 4294901760, %v200_v56  ;;  %v208_v10 = vand.u32 4294901760, %v207_v6  ;;  %v235_v45 = vsub.f32 %v2557_v2, %v234_v21  ;;  %v242_v46 = vsub.f32 %v2559_v3, %v241_v23 }
  0x42   :  { %v2624_v8 = vpack.c.bf16 %v194_v60, %v187_v58  ;;  %v222_v40 = vand.u32 4294901760, %v221_v14  ;;  %v229_v19 = vand.u32 4294901760, %v228_v15  ;;  %v249_v20 = vsub.f32 %v2561_v4, %v248_v24 }
  0x43   :  { %2037 = vmatpush3.bf16.msra.mxu0 %v2529_v49  ;;  %2181 = vmatpush3.bf16.msra.mxu1 %v2529_v49  ;;  %v2631_v16 = vpack.c.bf16 %v208_v10, %v201_v7  ;;  %v236_v53 = vand.u32 4294901760, %v235_v45  ;;  %v256_v56 = vsub.f32 %v2563_v5, %v255_v25  ;;  %v243_v21 = vand.u32 4294901760, %v242_v46 }
  0x44   :  { %2038 = vmatprep.subr.bf16.mxu0 %v2420_v0  ;;  %2182 = vmatprep.subr.bf16.mxu1 %v2420_v0  ;;  %v250_v60 = vand.u32 4294901760, %v249_v20  ;;  %v263_v23 = vsub.f32 %v2570_v9, %v262_v26  ;;  %v2658_v26 = vpack.c.bf16 %v2506_v35, %v2504_v34  ;;  %v2665_v10 = vpack.c.bf16 %v2522_v47, %v2515_v43 }
  0x45   :  { %v2643_v58 = vpack.c.bf16 %v236_v53, %v229_v19  ;;  %v257_v7 = vand.u32 4294901760, %v256_v56  ;;  %v2673_v34 = vpack.c.bf16 %v2537_v54, %v2526_v48  ;;  %v2679_v35 = vpack.c.bf16 %v2545_v59, %v2539_v55 }
  0x46   :  { %v2648_v6 = vpack.c.bf16 %v250_v60, %v243_v21  ;;  %v264_v24 = vand.u32 4294901760, %v263_v23  ;;  %v2685_v43 = vpack.c.bf16 %v2552_v62, %v2550_v61  ;;  %v2691_v47 = vpack.c.bf16 %v2557_v2, %v2554_v63 }
  0x47   :  { %2040 = vmatpush3.bf16.msra.mxu0 %v2531_v50  ;;  %2184 = vmatpush3.bf16.msra.mxu1 %v2531_v50  ;;  %v2697_v48 = vpack.c.bf16 %v2561_v4, %v2559_v3  ;;  %v2703_v54 = vpack.c.bf16 %v2570_v9, %v2563_v5  ;;  %v1395_v5 = vld [vmem:[%s2890_s2] ss:$0 sm:$0xff] }
  0x48   :  { %2041 = vmatprep.subr.bf16.mxu0 %v2420_v0  ;;  %2185 = vmatprep.subr.bf16.mxu1 %v2420_v0  ;;  %v2652_v25 = vpack.c.bf16 %v264_v24, %v257_v7 }
  0x4b   :  { %2043 = vmatpush3.bf16.msra.mxu0 %v2533_v51  ;;  %2187 = vmatpush3.bf16.msra.mxu1 %v2533_v51 }
  0x4c   :  { %2044 = vmatprep.subr.bf16.mxu0 %v2420_v0  ;;  %2188 = vmatprep.subr.bf16.mxu1 %v2420_v0 }
  0x4e   :  { %1633 = vmatmul.mubr.f32.vlgmr.msra.gmra.mrb[0].mxu0 %v148_v39  ;;  %v215_v39 = vand.u32 4294901760, %v214_v11 }
  0x4f   :  { %2046 = vmatpush3.bf16.msra.mxu0 %v2609_v41  ;;  %1667 = vmatprep.mubr.msk.f32.mxu0 %vm2421_vm0, %v2422_v1 }
  0x50   :  { %2047 = vmatprep.subr.bf16.mxu0 %v2420_v0  ;;  %v2637_v17 = vpack.c.bf16 %v222_v40, %v215_v39 }
  0x53   :  { %2049 = vmatpush3.bf16.msra.mxu0 %v2617_v57 }
  0x54   :  { %2050 = vmatprep.subr.bf16.mxu0 %v2420_v0 }
  0x57   :  { %2052 = vmatpush3.bf16.msra.mxu0 %v2624_v8 }
  0x58   :  { %2053 = vmatprep.subr.bf16.mxu0 %v2420_v0 }
  0x5b   :  { %2055 = vmatpush3.bf16.msra.mxu0 %v2631_v16 }
  0x5c   :  { %2056 = vmatprep.subr.bf16.mxu0 %v2420_v0 }
  0x5f   :  { %2058 = vmatpush3.bf16.msra.mxu0 %v2637_v17 }
  0x60   :  { %2059 = vmatprep.subr.bf16.mxu0 %v2420_v0 }
  0x63   :  { %2061 = vmatpush3.bf16.msra.mxu0 %v2643_v58 }
  0x64   :  { %2062 = vmatprep.subr.bf16.mxu0 %v2420_v0 }
  0x67   :  { %2064 = vmatpush3.bf16.msra.mxu0 %v2648_v6 }
  0x68   :  { %2065 = vmatprep.subr.bf16.mxu0 %v2420_v0 }
  0x6b   :  { %2067 = vmatpush3.bf16.msra.mxu0 %v2652_v25 }
  0x6c   :  { %2068 = vmatprep.subr.bf16.mxu0 %v2420_v0 }
  0x6e   :  { %1668 = vmatmul.mubr.f32.vlgmr.msra.gmra.mrb[0].mxu0 %v2499_v31 }
  0x6f   :  { %2070 = vmatpush3.bf16.msra.mxu0 %v2658_v26  ;;  %1702 = vmatprep.mubr.msk.f32.mxu0 %vm2421_vm0, %v2422_v1 }
  0x70   :  { %2071 = vmatprep.subr.bf16.mxu0 %v2420_v0 }
  0x73   :  { %2073 = vmatpush3.bf16.msra.mxu0 %v2665_v10 }
  0x74   :  { %2074 = vmatprep.subr.bf16.mxu0 %v2420_v0 }
  0x77   :  { %2076 = vmatpush3.bf16.msra.mxu0 %v2673_v34 }
  0x78   :  { %2077 = vmatprep.subr.bf16.mxu0 %v2420_v0 }
  0x7b   :  { %2079 = vmatpush3.bf16.msra.mxu0 %v2679_v35 }
  0x7c   :  { %2080 = vmatprep.subr.bf16.mxu0 %v2420_v0 }
  0x7f   :  { %2082 = vmatpush3.bf16.msra.mxu0 %v2685_v43 }
  0x80   :  { %2083 = vmatprep.subr.bf16.mxu0 %v2420_v0 }
  0x83   :  { %2085 = vmatpush3.bf16.msra.mxu0 %v2691_v47 }
  0x84   :  { %2086 = vmatprep.subr.bf16.mxu0 %v2420_v0 }
  0x87   :  { %2088 = vmatpush3.bf16.msra.mxu0 %v2697_v48 }
  0x88   :  { %2089 = vmatprep.subr.bf16.mxu0 %v2420_v0 }
  0x8b   :  { %2091 = vmatpush3.bf16.msra.mxu0 %v2703_v54 }
  0x8c   :  { %2092 = vmatprep.subr.bf16.mxu0 %v2420_v0 }
  0x8e   :  { %1703 = vmatmul.mubr.f32.vlgmr.msra.gmra.mrb[0].mxu0 %v2513_v42 }
  0x8f   :  { %2094 = vmatpush3.bf16.msra.mxu0 %v2482_v12  ;;  %1737 = vmatprep.mubr.msk.f32.mxu0 %vm2421_vm0, %v2422_v1 }
  0x90   :  { %2095 = vmatprep.subr.bf16.mxu0 %v2420_v0 }
  0x93   :  { %2097 = vmatpush3.bf16.msra.mxu0 %v2485_v13 }
  0x94   :  { %2098 = vmatprep.subr.bf16.mxu0 %v2420_v0 }
  0x97   :  { %2100 = vmatpush3.bf16.msra.mxu0 %v2491_v18 }
  0x98   :  { %2101 = vmatprep.subr.bf16.mxu0 %v2420_v0 }
  0x9b   :  { %2103 = vmatpush3.bf16.msra.mxu0 %v2502_v32 }
  0x9c   :  { %2104 = vmatprep.subr.bf16.mxu0 %v2420_v0 }
  0x9f   :  { %2106 = vmatpush3.bf16.msra.mxu0 %v2518_v44 }
  0xa0   :  { %2107 = vmatprep.subr.bf16.mxu0 %v2420_v0 }
  0xa3   :  { %2109 = vmatpush3.bf16.msra.mxu0 %v2529_v49 }
  0xa4   :  { %2110 = vmatprep.subr.bf16.mxu0 %v2420_v0 }
  0xa7   :  { %2112 = vmatpush3.bf16.msra.mxu0 %v2531_v50 }
  0xa8   :  { %2113 = vmatprep.subr.bf16.mxu0 %v2420_v0 }
  0xab   :  { %2115 = vmatpush3.bf16.msra.mxu0 %v2533_v51 }
  0xac   :  { %2116 = vmatprep.subr.bf16.mxu0 %v2420_v0 }
  0xae   :  { %1738 = vmatmul.mubr.f32.vlgmr.msra.gmra.mrb[0].mxu0 %v146_v52 }
  0xaf   :  { %2118 = vmatpush3.bf16.msra.mxu0 %v2587_v27  ;;  %1772 = vmatprep.mubr.msk.f32.mxu0 %vm2421_vm0, %v2422_v1 }
  0xb0   :  { %2119 = vmatprep.subr.bf16.mxu0 %v2420_v0 }
  0xb3   :  { %2121 = vmatpush3.bf16.msra.mxu0 %v2589_v28 }
  0xb4   :  { %2122 = vmatprep.subr.bf16.mxu0 %v2420_v0 }
  0xb7   :  { %2124 = vmatpush3.bf16.msra.mxu0 %v2591_v29 }
  0xb8   :  { %2125 = vmatprep.subr.bf16.mxu0 %v2420_v0 }
  0xbb   :  { %2127 = vmatpush3.bf16.msra.mxu0 %v2594_v30 }
  0xbc   :  { %2128 = vmatprep.subr.bf16.mxu0 %v2420_v0 }
  0xbf   :  { %2130 = vmatpush3.bf16.msra.mxu0 %v2596_v33 }
  0xc0   :  { %2131 = vmatprep.subr.bf16.mxu0 %v2420_v0 }
  0xc3   :  { %2133 = vmatpush3.bf16.msra.mxu0 %v2598_v36 }
  0xc4   :  { %2134 = vmatprep.subr.bf16.mxu0 %v2420_v0 }
  0xc7   :  { %2136 = vmatpush3.bf16.msra.mxu0 %v2600_v37 }
  0xc8   :  { %2137 = vmatprep.subr.bf16.mxu0 %v2420_v0 }
  0xcb   :  { %2139 = vmatpush3.bf16.msra.mxu0 %v2603_v38 }
  0xcc   :  { %2140 = vmatprep.subr.bf16.mxu0 %v2420_v0 }
  0xce   :  { %1773 = vmatmul.mubr.f32.vlgmr.msra.gmra.mrb[0].mxu0 %v2499_v31 }
  0xcf   :  { %2142 = vmatpush3.bf16.msra.mxu0 %v2482_v12  ;;  %1807 = vmatprep.mubr.msk.f32.mxu0 %vm2421_vm0, %v2422_v1 }
  0xd0   :  { %2143 = vmatprep.subr.bf16.mxu0 %v2420_v0 }
  0xd3   :  { %2145 = vmatpush3.bf16.msra.mxu0 %v2485_v13 }
  0xd4   :  { %2146 = vmatprep.subr.bf16.mxu0 %v2420_v0 }
  0xd7   :  { %2148 = vmatpush3.bf16.msra.mxu0 %v2491_v18 }
  0xd8   :  { %2149 = vmatprep.subr.bf16.mxu0 %v2420_v0 }
  0xdb   :  { %2151 = vmatpush3.bf16.msra.mxu0 %v2502_v32 }
  0xdc   :  { %2152 = vmatprep.subr.bf16.mxu0 %v2420_v0 }
  0xdf   :  { %2154 = vmatpush3.bf16.msra.mxu0 %v2518_v44 }
  0xe0   :  { %2155 = vmatprep.subr.bf16.mxu0 %v2420_v0 }
  0xe3   :  { %2157 = vmatpush3.bf16.msra.mxu0 %v2529_v49 }
  0xe4   :  { %2158 = vmatprep.subr.bf16.mxu0 %v2420_v0 }
  0xe7   :  { %2160 = vmatpush3.bf16.msra.mxu0 %v2531_v50 }
  0xe8   :  { %2161 = vmatprep.subr.bf16.mxu0 %v2420_v0 }
  0xeb   :  { %2163 = vmatpush3.bf16.msra.mxu0 %v2533_v51 }
  0xee   :  { %1808 = vmatmul.mubr.f32.vlgmr.msra.gmra.mrb[0].mxu0 %v2499_v31 }
 0x1c1   :  { %v700_v42 = vpop.f32.mrb[0].mxu0 }
 0x1c2   :  { %v704_v52 = vmul.f32 0.03125, %v700_v42  ;;  %v1809_v55 = vpop.f32.mrb[1].mxu0 }
 0x1c4   :  { %v2767_v59 = vsub.f32 %v2493_v22, %v704_v52 }
 0x1c6   :  { %v706_v61 = vmul.f32 %v2767_v59, %v2767_v59 }
 0x1c8   :  { %v2771_v62 = vand.u32 4294901760, %v706_v61 }
 0x1ca   :  { %v789_v63 = vsub.f32 %v706_v61, %v2771_v62 }
 0x1cc   :  { %v790_v2 = vand.u32 4294901760, %v789_v63 }
 0x1ce   :  { %v791_v3 = vsub.f32 %v789_v63, %v790_v2 }
 0x1d0   :  { %v792_v4 = vand.u32 4294901760, %v791_v3 }
 0x1d2   :  { %1843 = vmatmul.mubr.f32.vlgmr.msra.gmra.mrb[0].mxu1 %v792_v4 }
 0x1d3   :  { %2190 = vmatpush3.bf16.msra.mxu1 %v2609_v41  ;;  %1877 = vmatprep.mubr.msk.f32.mxu1 %vm2421_vm0, %v2422_v1 }
 0x1d4   :  { %2191 = vmatprep.subr.bf16.mxu1 %v2420_v0 }
 0x1d7   :  { %2193 = vmatpush3.bf16.msra.mxu1 %v2617_v57 }
 0x1d8   :  { %2194 = vmatprep.subr.bf16.mxu1 %v2420_v0 }
 0x1db   :  { %2196 = vmatpush3.bf16.msra.mxu1 %v2624_v8 }
 0x1dc   :  { %2197 = vmatprep.subr.bf16.mxu1 %v2420_v0 }
 0x1df   :  { %2199 = vmatpush3.bf16.msra.mxu1 %v2631_v16 }
 0x1e0   :  { %2200 = vmatprep.subr.bf16.mxu1 %v2420_v0 }
 0x1e3   :  { %2202 = vmatpush3.bf16.msra.mxu1 %v2637_v17 }
 0x1e4   :  { %2203 = vmatprep.subr.bf16.mxu1 %v2420_v0 }
 0x1e7   :  { %2205 = vmatpush3.bf16.msra.mxu1 %v2643_v58 }
 0x1e8   :  { %2206 = vmatprep.subr.bf16.mxu1 %v2420_v0 }
 0x1eb   :  { %2208 = vmatpush3.bf16.msra.mxu1 %v2648_v6 }
 0x1ec   :  { %2209 = vmatprep.subr.bf16.mxu1 %v2420_v0 }
 0x1ef   :  { %2211 = vmatpush3.bf16.msra.mxu1 %v2652_v25 }
 0x1f0   :  { %2212 = vmatprep.subr.bf16.mxu1 %v2420_v0 }
 0x1f2   :  { %1878 = vmatmul.mubr.f32.vlgmr.msra.gmra.mrb[0].mxu1 %v2771_v62 }
 0x1f3   :  { %2214 = vmatpush3.bf16.msra.mxu1 %v2658_v26  ;;  %1912 = vmatprep.mubr.msk.f32.mxu1 %vm2421_vm0, %v2422_v1 }
 0x1f4   :  { %2215 = vmatprep.subr.bf16.mxu1 %v2420_v0 }
 0x1f7   :  { %2217 = vmatpush3.bf16.msra.mxu1 %v2665_v10 }
 0x1f8   :  { %2218 = vmatprep.subr.bf16.mxu1 %v2420_v0 }
 0x1fb   :  { %2220 = vmatpush3.bf16.msra.mxu1 %v2673_v34 }
 0x1fc   :  { %2221 = vmatprep.subr.bf16.mxu1 %v2420_v0 }
 0x1ff   :  { %2223 = vmatpush3.bf16.msra.mxu1 %v2679_v35 }
 0x200   :  { %2224 = vmatprep.subr.bf16.mxu1 %v2420_v0 }
 0x203   :  { %2226 = vmatpush3.bf16.msra.mxu1 %v2685_v43 }
 0x204   :  { %2227 = vmatprep.subr.bf16.mxu1 %v2420_v0 }
 0x207   :  { %2229 = vmatpush3.bf16.msra.mxu1 %v2691_v47 }
 0x208   :  { %2230 = vmatprep.subr.bf16.mxu1 %v2420_v0 }
 0x20b   :  { %2232 = vmatpush3.bf16.msra.mxu1 %v2697_v48 }
 0x20c   :  { %2233 = vmatprep.subr.bf16.mxu1 %v2420_v0 }
 0x20f   :  { %2235 = vmatpush3.bf16.msra.mxu1 %v2703_v54 }
 0x210   :  { %2236 = vmatprep.subr.bf16.mxu1 %v2420_v0 }
 0x212   :  { %1913 = vmatmul.mubr.f32.vlgmr.msra.gmra.mrb[0].mxu1 %v789_v63 }
 0x213   :  { %2238 = vmatpush3.bf16.msra.mxu1 %v2482_v12  ;;  %1947 = vmatprep.mubr.msk.f32.mxu1 %vm2421_vm0, %v2422_v1 }
 0x214   :  { %2239 = vmatprep.subr.bf16.mxu1 %v2420_v0 }
 0x217   :  { %2241 = vmatpush3.bf16.msra.mxu1 %v2485_v13 }
 0x218   :  { %2242 = vmatprep.subr.bf16.mxu1 %v2420_v0 }
 0x21b   :  { %2244 = vmatpush3.bf16.msra.mxu1 %v2491_v18 }
 0x21c   :  { %2245 = vmatprep.subr.bf16.mxu1 %v2420_v0 }
 0x21f   :  { %2247 = vmatpush3.bf16.msra.mxu1 %v2502_v32 }
 0x220   :  { %2248 = vmatprep.subr.bf16.mxu1 %v2420_v0 }
 0x223   :  { %2250 = vmatpush3.bf16.msra.mxu1 %v2518_v44 }
 0x224   :  { %2251 = vmatprep.subr.bf16.mxu1 %v2420_v0 }
 0x227   :  { %2253 = vmatpush3.bf16.msra.mxu1 %v2529_v49 }
 0x228   :  { %2254 = vmatprep.subr.bf16.mxu1 %v2420_v0 }
 0x22b   :  { %2256 = vmatpush3.bf16.msra.mxu1 %v2531_v50 }
 0x22c   :  { %2257 = vmatprep.subr.bf16.mxu1 %v2420_v0 }
 0x22f   :  { %2259 = vmatpush3.bf16.msra.mxu1 %v2533_v51 }
 0x230   :  { %2260 = vmatprep.subr.bf16.mxu1 %v2420_v0 }
 0x232   :  { %1948 = vmatmul.mubr.f32.vlgmr.msra.gmra.mrb[0].mxu1 %v790_v2 }
 0x233   :  { %2262 = vmatpush3.bf16.msra.mxu1 %v2587_v27  ;;  %1982 = vmatprep.mubr.msk.f32.mxu1 %vm2421_vm0, %v2422_v1 }
 0x234   :  { %2263 = vmatprep.subr.bf16.mxu1 %v2420_v0 }
 0x237   :  { %2265 = vmatpush3.bf16.msra.mxu1 %v2589_v28 }
 0x238   :  { %2266 = vmatprep.subr.bf16.mxu1 %v2420_v0 }
 0x23b   :  { %2268 = vmatpush3.bf16.msra.mxu1 %v2591_v29 }
 0x23c   :  { %2269 = vmatprep.subr.bf16.mxu1 %v2420_v0 }
 0x23f   :  { %2271 = vmatpush3.bf16.msra.mxu1 %v2594_v30 }
 0x240   :  { %2272 = vmatprep.subr.bf16.mxu1 %v2420_v0 }
 0x243   :  { %2274 = vmatpush3.bf16.msra.mxu1 %v2596_v33 }
 0x244   :  { %2275 = vmatprep.subr.bf16.mxu1 %v2420_v0 }
 0x247   :  { %2277 = vmatpush3.bf16.msra.mxu1 %v2598_v36 }
 0x248   :  { %2278 = vmatprep.subr.bf16.mxu1 %v2420_v0 }
 0x24b   :  { %2280 = vmatpush3.bf16.msra.mxu1 %v2600_v37 }
 0x24c   :  { %2281 = vmatprep.subr.bf16.mxu1 %v2420_v0 }
 0x24f   :  { %2283 = vmatpush3.bf16.msra.mxu1 %v2603_v38 }
 0x250   :  { %2284 = vmatprep.subr.bf16.mxu1 %v2420_v0 }
 0x252   :  { %1983 = vmatmul.mubr.f32.vlgmr.msra.gmra.mrb[0].mxu1 %v2771_v62 }
 0x253   :  { %2286 = vmatpush3.bf16.msra.mxu1 %v2482_v12  ;;  %2017 = vmatprep.mubr.msk.f32.mxu1 %vm2421_vm0, %v2422_v1 }
 0x254   :  { %2287 = vmatprep.subr.bf16.mxu1 %v2420_v0 }
 0x257   :  { %2289 = vmatpush3.bf16.msra.mxu1 %v2485_v13 }
 0x258   :  { %2290 = vmatprep.subr.bf16.mxu1 %v2420_v0 }
 0x25b   :  { %2292 = vmatpush3.bf16.msra.mxu1 %v2491_v18 }
 0x25c   :  { %2293 = vmatprep.subr.bf16.mxu1 %v2420_v0 }
 0x25f   :  { %2295 = vmatpush3.bf16.msra.mxu1 %v2502_v32 }
 0x260   :  { %2296 = vmatprep.subr.bf16.mxu1 %v2420_v0 }
 0x263   :  { %2298 = vmatpush3.bf16.msra.mxu1 %v2518_v44 }
 0x264   :  { %2299 = vmatprep.subr.bf16.mxu1 %v2420_v0 }
 0x267   :  { %2301 = vmatpush3.bf16.msra.mxu1 %v2529_v49 }
 0x268   :  { %2302 = vmatprep.subr.bf16.mxu1 %v2420_v0 }
 0x26b   :  { %2304 = vmatpush3.bf16.msra.mxu1 %v2531_v50 }
 0x26c   :  { %2305 = vmatprep.subr.bf16.mxu1 %v2420_v0  ;;  %v1394_v0 = vld [vmem:[%s2889_s1] ss:$0 sm:$0xff] }
 0x26f   :  { %2307 = vmatpush3.bf16.msra.mxu1 %v2533_v51 }
 0x272   :  { %2018 = vmatmul.mubr.f32.vlgmr.msra.gmra.mrb[0].mxu1 %v2771_v62 }
 0x345   :  { %v1344_v1 = vpop.f32.mrb[0].mxu1 }
 0x346   :  { %v1348_v12 = vmul.f32 0.032258064, %v1344_v1  ;;  %v2019_v13 = vpop.f32.mrb[1].mxu1 }
 0x348   :  { %2338 = vrsqrt.f32 %v1348_v12  ;;  %vm1351_vm1 = vcmp.eq.f32.partialorder %v1348_v12, inf  ;;  %v1354_v31 = vand.u32 2147483648, %v1348_v12  ;;  %vm1353_vm2 = vcmp.eq.f32.partialorder %v1348_v12, 0.0 }
 0x352   :  { %v2339_v18 = vpop.eup %2338 }
 0x353   :  { %v1350_v22 = vmul.f32 %v2339_v18, %v1348_v12 }
 0x355   :  { %v1352_v32 = vsel %vm1351_vm1, %v1348_v12, %v1350_v22 }
 0x356   :  { %v1355_v44 = vsel %vm1353_vm2, %v1354_v31, %v1352_v32 }
 0x357   :  { %v1356_v49 = vadd.f32 1e-06, %v1355_v44 }
 0x359   :  { %2340 = vrcp.f32 %v1356_v49 }
 0x363   :  { %v2341_v50 = vpop.eup %2340 }
 0x364   :  { %v1360_v51 = vmul.f32 %v2341_v50, %v2767_v59 }
 0x366   :  { %v1367_v9 = vmul.f32 %v1394_v0, %v1360_v51 }
 0x368   :  { %v1374_v27 = vadd.f32 %v1395_v5, %v1367_v9 }
 0x36a   :  { %1375 = vst [vmem:[#allocation7] sm:$0xff] %v1374_v27 }
 0x36b   :  { %1380 = vsyncadd [#allocation4], 64  ;;  %s2423_s20 = smov [#allocation7]  }
 0x36c   :  { %s1381_s21 = sshll.u32 %s2423_s20, 4  ;;  %s1382_s21 = int_to_ptr.vmem [resolvable:$true] %s1381_s21 }
 0x36d   :  { %s2386_s22 = scalar_lea.vmem %s1382_s21, 64  ;;  %s2390_s23 = scalar_lea.vmem %s1382_s21, 128 }
 0x36e   :  { %p2387_p2 = scmp.ne.s32.totalorder %s1382_s21, %s2386_s22  ;;  %p2391_p3 = scmp.lt.s32.totalorder %s1382_s21, %s1382_s21 }
 0x36f   :  { %p2392_p4 = scmp.lt.s32.totalorder %s2390_s23, %s2386_s22 }
 0x371   :  { %p2393_p5 = por %p2392_p4, %p2391_p3 }
 0x373   :  { %p2394_p6 = pnand %p2393_p5, %p2387_p2 }
 0x375   :  { %2397 = shalt.err (!%p2394_p6)
}
 0x376   :  { %s2398_s25 = scalar_lea.hbm %s2892_s4, 64 }
 0x377   :  { %p2399_p7 = scmp.ne.s32.totalorder %s2892_s4, %s2398_s25  ;;  %p2402_p8 = scmp.lt.u32.totalorder %s2398_s25, %s2892_s4 }
 0x379   :  { %p2404_p9 = pnand %p2402_p8, %p2399_p7 }
 0x37b   :  { %2407 = shalt.err (!%p2404_p9)
}
 0x37c   :  { %1387 = dma.vmem_to_hbm [thread:$0]  %s1382_s21, 64, %s2892_s4, [#allocation4], %s2415_s26, %s2415_s26, %s2416_s27  }
 0x37d   :  { %2412 = dma.done.wait [#allocation4], 128  }
 0x37e   :  { %2413 = vsyncadd [#allocation4], 4294967168 }
 0x37f   :  { %1391 = vsyncpa [#allocation3], 1 }
 0x380   :  { %1392 = vsyncpa [#allocation6], 1 }
 0x381   :  { %1393 = vsyncpa [#allocation4], 1 }

// kernel: tpu_custom_call.1
= control target key start
LH: loop header
LB: loop body
LE: loop exit
PB: predicated region body
PF: predicated region fallthrough
CT: control target
= control target key end

     0   :  { %8 = vsyncpa [#allocation3], 0  ;;  %s238_s0 = inlined_call_operand.hbm [shape: f32[16,32], index: 0, kind: input, shape index: {}]   ;;  %s239_s1 = inlined_call_operand.vmem [shape: f32[1,32], index: 1, kind: input, shape index: {}]   ;;  %s240_s2 = inlined_call_operand.vmem [shape: f32[1,32], index: 2, kind: input, shape index: {}]   ;;  %s241_s3 = inlined_call_operand.hbm [shape: f32[16,32], index: 3, kind: output, shape index: {}]  }
   0x1   :  { %9 = vsyncpa [#allocation4], 0  ;;  %s172_s12 = smov [#allocation2]   ;;  %s124_s16 = scalar_lea.hbm %s238_s0, 256 }
   0x2   :  { %s15_s13 = sshll.u32 %s172_s12, 4  ;;  %p125_p0 = scmp.ne.s32.totalorder %s238_s0, %s124_s16  ;;  %s16_s13 = int_to_ptr.vmem [resolvable:$true] %s15_s13 }
   0x3   :  { %p128_p1 = scmp.lt.u32.totalorder %s124_s16, %s238_s0 }
   0x5   :  { %p130_p2 = pnand %p128_p1, %p125_p0 }
   0x7   :  { %133 = shalt.err (!%p130_p2)
}
   0x8   :  { %s134_s21 = scalar_lea.vmem %s16_s13, 256  ;;  %p139_p4 = scmp.lt.s32.totalorder %s16_s13, %s16_s13 }
   0x9   :  { %p135_p3 = scmp.ne.s32.totalorder %s16_s13, %s134_s21  ;;  %p140_p5 = scmp.lt.s32.totalorder %s134_s21, %s134_s21 }
   0xb   :  { %p141_p6 = por %p140_p5, %p139_p4 }
   0xd   :  { %p142_p7 = pnand %p141_p6, %p135_p3 }
   0xf   :  { %145 = shalt.err (!%p142_p7)
}
  0x10   :  { %s173_s22 = smov 128   ;;  %s174_s23 = smov 8  }
  0x11   :  { %21 = dma.hbm_to_vmem [thread:$0]  %s238_s0, 256, %s16_s13, [#allocation3], %s173_s22, %s173_s22, %s174_s23  }
  0x12   :  { %168 = dma.done.wait [#allocation3], 256  }
  0x13   :  { %169 = vsyncadd [#allocation3], 4294967040  ;;  %vm31_vm0 = vcmask 261120   ;;  %v29_v0 = vld [vmem:[#allocation2] sm:$0xff]  ;;  %v30_v1 = vld [vmem:[#allocation2 + $0x8] sm:$0xff]  ;;  %s175_s29 = smov [#allocation5]  }
  0x14   :  { %v32_v2 = vsel %vm31_vm0, %v29_v0, 0.0  ;;  %v35_v3 = vsel %vm31_vm0, %v30_v1, 0.0  ;;  %v110_v31 = vld [vmem:[%s239_s1] ss:$0 sm:$0xff]  ;;  %s98_s30 = sshll.u32 %s175_s29, 4  ;;  %s99_s30 = int_to_ptr.vmem [resolvable:$true] %s98_s30 }
  0x15   :  { %33 = vadd.xlane.f32.xlu0 %v32_v2  ;;  %v111_v33 = vld [vmem:[%s240_s2] ss:$0 sm:$0xff]  ;;  %s146_s4 = scalar_lea.vmem %s99_s30, 256  ;;  %p151_p9 = scmp.lt.s32.totalorder %s99_s30, %s99_s30 }
  0x16   :  { %p147_p8 = scmp.ne.s32.totalorder %s99_s30, %s146_s4  ;;  %p152_p10 = scmp.lt.s32.totalorder %s146_s4, %s146_s4 }
  0x18   :  { %p153_p11 = por %p152_p10, %p151_p9 }
  0x19   :  { %36 = vadd.xlane.f32.xlu0 %v35_v3 }
  0x1a   :  { %p154_p12 = pnand %p153_p11, %p147_p8 }
  0xa2   :  { %v34_v4 = vpop.xlane.xlu0 %33 }
  0xa3   :  { %v39_v5 = vmul.f32 0.03125, %v34_v4 }
  0xa5   :  { %v41_v6 = vsub.f32 %v29_v0, %v39_v5 }
  0xa6   :  { %v37_v7 = vpop.xlane.xlu0 %36 }
  0xa7   :  { %v40_v8 = vmul.f32 0.03125, %v37_v7  ;;  %v43_v9 = vmul.f32 %v41_v6, %v41_v6 }
  0xa9   :  { %v42_v10 = vsub.f32 %v30_v1, %v40_v8  ;;  %v45_v11 = vsel %vm31_vm0, %v43_v9, 0.0 }
  0xaa   :  { %46 = vadd.xlane.f32.xlu1 %v45_v11 }
  0xab   :  { %v44_v12 = vmul.f32 %v42_v10, %v42_v10 }
  0xad   :  { %v48_v13 = vsel %vm31_vm0, %v44_v12, 0.0 }
  0xae   :  { %49 = vadd.xlane.f32.xlu1 %v48_v13 }
 0x137   :  { %v47_v14 = vpop.xlane.xlu1 %46 }
 0x138   :  { %v51_v15 = vmul.f32 0.032258064, %v47_v14 }
 0x13a   :  { %116 = vrsqrt.f32 %v51_v15  ;;  %vm55_vm1 = vcmp.eq.f32.partialorder %v51_v15, inf  ;;  %v58_v20 = vand.u32 2147483648, %v51_v15  ;;  %vm57_vm2 = vcmp.eq.f32.partialorder %v51_v15, 0.0 }
 0x13b   :  { %v50_v16 = vpop.xlane.xlu1 %49 }
 0x13c   :  { %v52_v17 = vmul.f32 0.032258064, %v50_v16 }
 0x13e   :  { %118 = vrsqrt.f32 %v52_v17  ;;  %vm62_vm3 = vcmp.eq.f32.partialorder %v52_v17, inf  ;;  %v65_v26 = vand.u32 2147483648, %v52_v17  ;;  %vm64_vm4 = vcmp.eq.f32.partialorder %v52_v17, 0.0 }
 0x144   :  { %v117_v18 = vpop.eup %116 }
 0x145   :  { %v54_v19 = vmul.f32 %v117_v18, %v51_v15 }
 0x147   :  { %v56_v21 = vsel %vm55_vm1, %v51_v15, %v54_v19 }
 0x148   :  { %v119_v22 = vpop.eup %118  ;;  %v59_v23 = vsel %vm57_vm2, %v58_v20, %v56_v21 }
 0x149   :  { %v67_v24 = vadd.f32 1e-06, %v59_v23  ;;  %v61_v25 = vmul.f32 %v119_v22, %v52_v17 }
 0x14b   :  { %120 = vrcp.f32 %v67_v24  ;;  %v63_v27 = vsel %vm62_vm3, %v52_v17, %v61_v25 }
 0x14c   :  { %v66_v28 = vsel %vm64_vm4, %v65_v26, %v63_v27 }
 0x14d   :  { %v68_v29 = vadd.f32 1e-06, %v66_v28 }
 0x14f   :  { %122 = vrcp.f32 %v68_v29 }
 0x155   :  { %v121_v30 = vpop.eup %120 }
 0x156   :  { %v73_v32 = vmul.f32 %v121_v30, %v41_v6 }
 0x158   :  { %v81_v34 = vmul.f32 %v110_v31, %v73_v32 }
 0x159   :  { %v123_v35 = vpop.eup %122 }
 0x15a   :  { %v74_v36 = vmul.f32 %v123_v35, %v42_v10  ;;  %v89_v37 = vadd.f32 %v111_v33, %v81_v34 }
 0x15c   :  { %v82_v38 = vmul.f32 %v110_v31, %v74_v36  ;;  %91 = vst.msk [vmem:[#allocation5] sm:$0xff] %vm31_vm0, %v89_v37 }
 0x15e   :  { %v90_v39 = vadd.f32 %v111_v33, %v82_v38 }
 0x160   :  { %92 = vst.msk [vmem:[#allocation5 + $0x8] sm:$0xff] %vm31_vm0, %v90_v39 }
 0x161   :  { %157 = shalt.err (!%p154_p12)
}
 0x162   :  { %s158_s5 = scalar_lea.hbm %s241_s3, 256 }
 0x163   :  { %p159_p13 = scmp.ne.s32.totalorder %s241_s3, %s158_s5  ;;  %p162_p0 = scmp.lt.u32.totalorder %s158_s5, %s241_s3 }
 0x165   :  { %p164_p1 = pnand %p162_p0, %p159_p13 }
 0x167   :  { %167 = shalt.err (!%p164_p1)
}
 0x168   :  { %104 = dma.vmem_to_hbm [thread:$0]  %s99_s30, 256, %s241_s3, [#allocation4], %s173_s22, %s173_s22, %s174_s23  }
 0x169   :  { %170 = dma.done.wait [#allocation4], 256  }
 0x16a   :  { %171 = vsyncadd [#allocation4], 4294967040 }
 0x16b   :  { %108 = vsyncpa [#allocation3], 1 }
 0x16c   :  { %109 = vsyncpa [#allocation4], 1 }

</bundles_post_ra>
